<compile_context>
chip_gen: v7x
topology: tpu7x:2x2x1
jax: 0.10.0
libtpu: 0.0.40
codegen_flags: <defaults>
</compile_context>

<pallas_src>
import jax
import jax.numpy as jnp
from jax import lax
from jax.experimental import pallas as pl
from jax.experimental.pallas import tpu as pltpu

TOKEN_BLOCK = 256     # tokens gathered per grid step (lane-dense output tile)
NUM_INFLIGHT = 8      # in-flight per-row DMAs (hides HBM latency)


def _round_up(x, m):
    return ((x + m - 1) // m) * m


def _embed_gather_kernel(ids_ref, table_hbm, out_ref, sems):
    # ids_ref:   SMEM i32[padded_tokens]        all flat token ids (scalar prefetch)
    # table_hbm: HBM  [vocab, hidden]           full embedding table, never auto-DMA'd
    # out_ref:   VMEM [tb, hidden]              output tile for this token block
    # sems:      DMA semaphores, shape (depth,) one per in-flight row copy
    i = pl.program_id(0)
    tb = out_ref.shape[0]
    base = i * tb
    depth = sems.shape[0]

    def issue(t, row):
        # Copy one embedding row HBM -> its slot in the output VMEM tile.
        pltpu.make_async_copy(
            table_hbm.at[pl.ds(row, 1), :],
            out_ref.at[pl.ds(t, 1), :],
            sems.at[t % depth],
        ).start()

    # Prime the pipeline with `depth` row copies.
    @pl.loop(0, depth, unroll=True)
    def _(t):
        issue(t, ids_ref[base + t])

    # Steady state: retire copy t (freeing its semaphore slot), then issue
    # copy t + depth into the same slot.  Every copy is waited exactly once,
    # so all DMAs are complete before the body ends (safe output writeback).
    @pl.loop(0, tb)
    def _(t):
        nxt = t + depth
        # Read the next id from SMEM *before* the wait (sst->sld forwarding).
        row_next = ids_ref[base + jnp.minimum(nxt, tb - 1)]

        pltpu.make_async_copy(
            table_hbm.at[pl.ds(0, 1), :],          # shape-only for the wait
            out_ref.at[pl.ds(t, 1), :],            # actual dst of copy t
            sems.at[t % depth],
        ).wait()

        @pl.when(nxt < tb)
        def _():
            issue(nxt, row_next)


def embedding_forward(input_ids, table, *, token_block=TOKEN_BLOCK):
    """input_ids: (batch, seq) int; table: (vocab, hidden).
    Returns (batch, seq, hidden) == nn.Embedding lookup.
    Note: out-of-range ids are clamped to [0, vocab) instead of raising."""
    batch, seq = input_ids.shape
    vocab, hidden = table.shape
    num_tokens = batch * seq

    # Token tile: at most TOKEN_BLOCK, at least sublane-aligned (8).
    tb = min(token_block, _round_up(num_tokens, 8))
    padded_tokens = _round_up(num_tokens, tb)
    depth = min(NUM_INFLIGHT, tb)

    flat_ids = input_ids.reshape(-1).astype(jnp.int32)
    # Clamp so padded / stray ids can never drive an OOB HBM DMA.
    flat_ids = jnp.clip(flat_ids, 0, vocab - 1)
    if padded_tokens != num_tokens:
        flat_ids = jnp.pad(flat_ids, (0, padded_tokens - num_tokens))

    grid = (padded_tokens // tb,)

    out_flat = pl.pallas_call(
        _embed_gather_kernel,
        out_shape=jax.ShapeDtypeStruct((padded_tokens, hidden), table.dtype),
        grid_spec=pltpu.PrefetchScalarGridSpec(
            num_scalar_prefetch=1,                     # flat_ids -> SMEM
            grid=grid,
            in_specs=[
                # Embedding table stays in HBM; rows are gathered manually.
                pl.BlockSpec(memory_space=pl.ANY),
            ],
            out_specs=pl.BlockSpec((tb, hidden), lambda i, ids: (i, 0)),
            scratch_shapes=[pltpu.SemaphoreType.DMA((depth,))],
        ),
        compiler_params=pltpu.CompilerParams(
            # Token blocks are independent -> megacore sharding on v7x.
            dimension_semantics=("parallel",),
        ),
    )(flat_ids, table)

    return out_flat[:num_tokens].reshape(batch, seq, hidden)


if __name__ == "__main__":
    key = jax.random.PRNGKey(0)
    k_tab, k_ids = jax.random.split(key)

    # Deterministic synthetic parameters (stand-in for transformer.embed_tokens.weight)
    VOCAB, HIDDEN = 256, 128
    table = jax.random.normal(k_tab, (VOCAB, HIDDEN), dtype=jnp.float32) * 0.02

    batch, seq = 2, 8
    input_ids = jax.random.randint(k_ids, (batch, seq), 0, VOCAB, dtype=jnp.int32)

    out = embedding_forward(input_ids, table)
    out = jax.block_until_ready(out)

    # Reference check: plain JAX gather (DMA gather is byte-exact).
    ref = jnp.take(table, input_ids.reshape(-1), axis=0).reshape(batch, seq, HIDDEN)
    assert out.shape == (batch, seq, HIDDEN)
    assert jnp.allclose(out, ref), "mismatch vs reference embedding lookup"

    print("KERNEL_OK")
</pallas_src>

<mosaic_0001>
module attributes {stable_mosaic.version = 11 : i64} {
  func.func @_embed_gather_kernel(%arg0: i32, %arg1: memref<16xi32, #tpu.memory_space<smem>>, %arg2: memref<256x128xf32, #tpu.memory_space<any>>, %arg3: memref<16x128xf32, #tpu.memory_space<vmem>>, %arg4: memref<8x!tpu.dma_semaphore, #tpu.memory_space<semaphore_mem>>) attributes {dimension_semantics = [#tpu.dimension_semantics<parallel>], iteration_bounds = array<i64: 1>, scalar_prefetch = 1 : i64, scratch_operands = 1 : i64, tpu.core_type = #tpu.core_type<tc>, window_params = [{}, {transform_indices = @transform_1, window_bounds = array<i64: 16, 128>}]} {
    %c16_i32 = arith.constant 16 : i32
    %0 = arith.muli %arg0, %c16_i32 : i32
    %c0_i32 = arith.constant 0 : i32
    %c1_i32 = arith.constant 1 : i32
    %1 = arith.muli %c0_i32, %c1_i32 : i32
    %c0_i32_0 = arith.constant 0 : i32
    %2 = arith.addi %c0_i32_0, %1 : i32
    %3 = arith.addi %0, %2 : i32
    %4 = arith.index_cast %3 : i32 to index
    %5 = memref.load %arg1[%4] : memref<16xi32, #tpu.memory_space<smem>>
    %c8_i32 = arith.constant 8 : i32
    %c0_i32_1 = arith.constant 0 : i32
    %6 = arith.cmpi eq, %c8_i32, %c0_i32_1 : i32
    %c1_i32_2 = arith.constant 1 : i32
    %7 = arith.select %6, %c1_i32_2, %c8_i32 : i32
    %8 = arith.remsi %2, %7 : i32
    %c0_i32_3 = arith.constant 0 : i32
    %9 = arith.cmpi ne, %8, %c0_i32_3 : i32
    %c0_i32_4 = arith.constant 0 : i32
    %10 = arith.cmpi slt, %8, %c0_i32_4 : i32
    %c0_i32_5 = arith.constant 0 : i32
    %11 = arith.cmpi slt, %7, %c0_i32_5 : i32
    %12 = arith.xori %10, %11 : i1
    %13 = arith.andi %12, %9 : i1
    %14 = arith.addi %8, %7 : i32
    %15 = arith.select %13, %14, %8 : i32
    %c0_i32_6 = arith.constant 0 : i32
    %16 = tpu.memref_slice %arg2[%5, %c0_i32_6] : memref<256x128xf32, #tpu.memory_space<any>> -> memref<1x128xf32, #tpu.memory_space<any>>
    %c0_i32_7 = arith.constant 0 : i32
    %17 = tpu.memref_slice %arg3[%2, %c0_i32_7] : memref<16x128xf32, #tpu.memory_space<vmem>> -> memref<1x128xf32, #tpu.memory_space<vmem>>
    %18 = tpu.memref_slice %arg4[%15] : memref<8x!tpu.dma_semaphore, #tpu.memory_space<semaphore_mem>> -> memref<1x!tpu.dma_semaphore, #tpu.memory_space<semaphore_mem>>
    %19 = tpu.memref_squeeze %18 : memref<1x!tpu.dma_semaphore, #tpu.memory_space<semaphore_mem>> -> memref<!tpu.dma_semaphore, #tpu.memory_space<semaphore_mem>>
    tpu.enqueue_dma source(%16 : memref<1x128xf32, #tpu.memory_space<any>>) target(%17 : memref<1x128xf32, #tpu.memory_space<vmem>>) target_semaphore(%19 : memref<!tpu.dma_semaphore, #tpu.memory_space<semaphore_mem>>)
    %c1_i32_8 = arith.constant 1 : i32
    %c1_i32_9 = arith.constant 1 : i32
    %20 = arith.muli %c1_i32_8, %c1_i32_9 : i32
    %c0_i32_10 = arith.constant 0 : i32
    %21 = arith.addi %c0_i32_10, %20 : i32
    %22 = arith.addi %0, %21 : i32
    %23 = arith.index_cast %22 : i32 to index
    %24 = memref.load %arg1[%23] : memref<16xi32, #tpu.memory_space<smem>>
    %c8_i32_11 = arith.constant 8 : i32
    %c0_i32_12 = arith.constant 0 : i32
    %25 = arith.cmpi eq, %c8_i32_11, %c0_i32_12 : i32
    %c1_i32_13 = arith.constant 1 : i32
    %26 = arith.select %25, %c1_i32_13, %c8_i32_11 : i32
    %27 = arith.remsi %21, %26 : i32
    %c0_i32_14 = arith.constant 0 : i32
    %28 = arith.cmpi ne, %27, %c0_i32_14 : i32
    %c0_i32_15 = arith.constant 0 : i32
    %29 = arith.cmpi slt, %27, %c0_i32_15 : i32
    %c0_i32_16 = arith.constant 0 : i32
    %30 = arith.cmpi slt, %26, %c0_i32_16 : i32
    %31 = arith.xori %29, %30 : i1
    %32 = arith.andi %31, %28 : i1
    %33 = arith.addi %27, %26 : i32
    %34 = arith.select %32, %33, %27 : i32
    %c0_i32_17 = arith.constant 0 : i32
    %35 = tpu.memref_slice %arg2[%24, %c0_i32_17] : memref<256x128xf32, #tpu.memory_space<any>> -> memref<1x128xf32, #tpu.memory_space<any>>
    %c0_i32_18 = arith.constant 0 : i32
    %36 = tpu.memref_slice %arg3[%21, %c0_i32_18] : memref<16x128xf32, #tpu.memory_space<vmem>> -> memref<1x128xf32, #tpu.memory_space<vmem>>
    %37 = tpu.memref_slice %arg4[%34] : memref<8x!tpu.dma_semaphore, #tpu.memory_space<semaphore_mem>> -> memref<1x!tpu.dma_semaphore, #tpu.memory_space<semaphore_mem>>
    %38 = tpu.memref_squeeze %37 : memref<1x!tpu.dma_semaphore, #tpu.memory_space<semaphore_mem>> -> memref<!tpu.dma_semaphore, #tpu.memory_space<semaphore_mem>>
    tpu.enqueue_dma source(%35 : memref<1x128xf32, #tpu.memory_space<any>>) target(%36 : memref<1x128xf32, #tpu.memory_space<vmem>>) target_semaphore(%38 : memref<!tpu.dma_semaphore, #tpu.memory_space<semaphore_mem>>)
    %c2_i32 = arith.constant 2 : i32
    %c1_i32_19 = arith.constant 1 : i32
    %39 = arith.muli %c2_i32, %c1_i32_19 : i32
    %c0_i32_20 = arith.constant 0 : i32
    %40 = arith.addi %c0_i32_20, %39 : i32
    %41 = arith.addi %0, %40 : i32
    %42 = arith.index_cast %41 : i32 to index
    %43 = memref.load %arg1[%42] : memref<16xi32, #tpu.memory_space<smem>>
    %c8_i32_21 = arith.constant 8 : i32
    %c0_i32_22 = arith.constant 0 : i32
    %44 = arith.cmpi eq, %c8_i32_21, %c0_i32_22 : i32
    %c1_i32_23 = arith.constant 1 : i32
    %45 = arith.select %44, %c1_i32_23, %c8_i32_21 : i32
    %46 = arith.remsi %40, %45 : i32
    %c0_i32_24 = arith.constant 0 : i32
    %47 = arith.cmpi ne, %46, %c0_i32_24 : i32
    %c0_i32_25 = arith.constant 0 : i32
    %48 = arith.cmpi slt, %46, %c0_i32_25 : i32
    %c0_i32_26 = arith.constant 0 : i32
    %49 = arith.cmpi slt, %45, %c0_i32_26 : i32
    %50 = arith.xori %48, %49 : i1
    %51 = arith.andi %50, %47 : i1
    %52 = arith.addi %46, %45 : i32
    %53 = arith.select %51, %52, %46 : i32
    %c0_i32_27 = arith.constant 0 : i32
    %54 = tpu.memref_slice %arg2[%43, %c0_i32_27] : memref<256x128xf32, #tpu.memory_space<any>> -> memref<1x128xf32, #tpu.memory_space<any>>
    %c0_i32_28 = arith.constant 0 : i32
    %55 = tpu.memref_slice %arg3[%40, %c0_i32_28] : memref<16x128xf32, #tpu.memory_space<vmem>> -> memref<1x128xf32, #tpu.memory_space<vmem>>
    %56 = tpu.memref_slice %arg4[%53] : memref<8x!tpu.dma_semaphore, #tpu.memory_space<semaphore_mem>> -> memref<1x!tpu.dma_semaphore, #tpu.memory_space<semaphore_mem>>
    %57 = tpu.memref_squeeze %56 : memref<1x!tpu.dma_semaphore, #tpu.memory_space<semaphore_mem>> -> memref<!tpu.dma_semaphore, #tpu.memory_space<semaphore_mem>>
    tpu.enqueue_dma source(%54 : memref<1x128xf32, #tpu.memory_space<any>>) target(%55 : memref<1x128xf32, #tpu.memory_space<vmem>>) target_semaphore(%57 : memref<!tpu.dma_semaphore, #tpu.memory_space<semaphore_mem>>)
    %c3_i32 = arith.constant 3 : i32
    %c1_i32_29 = arith.constant 1 : i32
    %58 = arith.muli %c3_i32, %c1_i32_29 : i32
    %c0_i32_30 = arith.constant 0 : i32
    %59 = arith.addi %c0_i32_30, %58 : i32
    %60 = arith.addi %0, %59 : i32
    %61 = arith.index_cast %60 : i32 to index
    %62 = memref.load %arg1[%61] : memref<16xi32, #tpu.memory_space<smem>>
    %c8_i32_31 = arith.constant 8 : i32
    %c0_i32_32 = arith.constant 0 : i32
    %63 = arith.cmpi eq, %c8_i32_31, %c0_i32_32 : i32
    %c1_i32_33 = arith.constant 1 : i32
    %64 = arith.select %63, %c1_i32_33, %c8_i32_31 : i32
    %65 = arith.remsi %59, %64 : i32
    %c0_i32_34 = arith.constant 0 : i32
    %66 = arith.cmpi ne, %65, %c0_i32_34 : i32
    %c0_i32_35 = arith.constant 0 : i32
    %67 = arith.cmpi slt, %65, %c0_i32_35 : i32
    %c0_i32_36 = arith.constant 0 : i32
    %68 = arith.cmpi slt, %64, %c0_i32_36 : i32
    %69 = arith.xori %67, %68 : i1
    %70 = arith.andi %69, %66 : i1
    %71 = arith.addi %65, %64 : i32
    %72 = arith.select %70, %71, %65 : i32
    %c0_i32_37 = arith.constant 0 : i32
    %73 = tpu.memref_slice %arg2[%62, %c0_i32_37] : memref<256x128xf32, #tpu.memory_space<any>> -> memref<1x128xf32, #tpu.memory_space<any>>
    %c0_i32_38 = arith.constant 0 : i32
    %74 = tpu.memref_slice %arg3[%59, %c0_i32_38] : memref<16x128xf32, #tpu.memory_space<vmem>> -> memref<1x128xf32, #tpu.memory_space<vmem>>
    %75 = tpu.memref_slice %arg4[%72] : memref<8x!tpu.dma_semaphore, #tpu.memory_space<semaphore_mem>> -> memref<1x!tpu.dma_semaphore, #tpu.memory_space<semaphore_mem>>
    %76 = tpu.memref_squeeze %75 : memref<1x!tpu.dma_semaphore, #tpu.memory_space<semaphore_mem>> -> memref<!tpu.dma_semaphore, #tpu.memory_space<semaphore_mem>>
    tpu.enqueue_dma source(%73 : memref<1x128xf32, #tpu.memory_space<any>>) target(%74 : memref<1x128xf32, #tpu.memory_space<vmem>>) target_semaphore(%76 : memref<!tpu.dma_semaphore, #tpu.memory_space<semaphore_mem>>)
    %c4_i32 = arith.constant 4 : i32
    %c1_i32_39 = arith.constant 1 : i32
    %77 = arith.muli %c4_i32, %c1_i32_39 : i32
    %c0_i32_40 = arith.constant 0 : i32
    %78 = arith.addi %c0_i32_40, %77 : i32
    %79 = arith.addi %0, %78 : i32
    %80 = arith.index_cast %79 : i32 to index
    %81 = memref.load %arg1[%80] : memref<16xi32, #tpu.memory_space<smem>>
    %c8_i32_41 = arith.constant 8 : i32
    %c0_i32_42 = arith.constant 0 : i32
    %82 = arith.cmpi eq, %c8_i32_41, %c0_i32_42 : i32
    %c1_i32_43 = arith.constant 1 : i32
    %83 = arith.select %82, %c1_i32_43, %c8_i32_41 : i32
    %84 = arith.remsi %78, %83 : i32
    %c0_i32_44 = arith.constant 0 : i32
    %85 = arith.cmpi ne, %84, %c0_i32_44 : i32
    %c0_i32_45 = arith.constant 0 : i32
    %86 = arith.cmpi slt, %84, %c0_i32_45 : i32
    %c0_i32_46 = arith.constant 0 : i32
    %87 = arith.cmpi slt, %83, %c0_i32_46 : i32
    %88 = arith.xori %86, %87 : i1
    %89 = arith.andi %88, %85 : i1
    %90 = arith.addi %84, %83 : i32
    %91 = arith.select %89, %90, %84 : i32
    %c0_i32_47 = arith.constant 0 : i32
    %92 = tpu.memref_slice %arg2[%81, %c0_i32_47] : memref<256x128xf32, #tpu.memory_space<any>> -> memref<1x128xf32, #tpu.memory_space<any>>
    %c0_i32_48 = arith.constant 0 : i32
    %93 = tpu.memref_slice %arg3[%78, %c0_i32_48] : memref<16x128xf32, #tpu.memory_space<vmem>> -> memref<1x128xf32, #tpu.memory_space<vmem>>
    %94 = tpu.memref_slice %arg4[%91] : memref<8x!tpu.dma_semaphore, #tpu.memory_space<semaphore_mem>> -> memref<1x!tpu.dma_semaphore, #tpu.memory_space<semaphore_mem>>
    %95 = tpu.memref_squeeze %94 : memref<1x!tpu.dma_semaphore, #tpu.memory_space<semaphore_mem>> -> memref<!tpu.dma_semaphore, #tpu.memory_space<semaphore_mem>>
    tpu.enqueue_dma source(%92 : memref<1x128xf32, #tpu.memory_space<any>>) target(%93 : memref<1x128xf32, #tpu.memory_space<vmem>>) target_semaphore(%95 : memref<!tpu.dma_semaphore, #tpu.memory_space<semaphore_mem>>)
    %c5_i32 = arith.constant 5 : i32
    %c1_i32_49 = arith.constant 1 : i32
    %96 = arith.muli %c5_i32, %c1_i32_49 : i32
    %c0_i32_50 = arith.constant 0 : i32
    %97 = arith.addi %c0_i32_50, %96 : i32
    %98 = arith.addi %0, %97 : i32
    %99 = arith.index_cast %98 : i32 to index
    %100 = memref.load %arg1[%99] : memref<16xi32, #tpu.memory_space<smem>>
    %c8_i32_51 = arith.constant 8 : i32
    %c0_i32_52 = arith.constant 0 : i32
    %101 = arith.cmpi eq, %c8_i32_51, %c0_i32_52 : i32
    %c1_i32_53 = arith.constant 1 : i32
    %102 = arith.select %101, %c1_i32_53, %c8_i32_51 : i32
    %103 = arith.remsi %97, %102 : i32
    %c0_i32_54 = arith.constant 0 : i32
    %104 = arith.cmpi ne, %103, %c0_i32_54 : i32
    %c0_i32_55 = arith.constant 0 : i32
    %105 = arith.cmpi slt, %103, %c0_i32_55 : i32
    %c0_i32_56 = arith.constant 0 : i32
    %106 = arith.cmpi slt, %102, %c0_i32_56 : i32
    %107 = arith.xori %105, %106 : i1
    %108 = arith.andi %107, %104 : i1
    %109 = arith.addi %103, %102 : i32
    %110 = arith.select %108, %109, %103 : i32
    %c0_i32_57 = arith.constant 0 : i32
    %111 = tpu.memref_slice %arg2[%100, %c0_i32_57] : memref<256x128xf32, #tpu.memory_space<any>> -> memref<1x128xf32, #tpu.memory_space<any>>
    %c0_i32_58 = arith.constant 0 : i32
    %112 = tpu.memref_slice %arg3[%97, %c0_i32_58] : memref<16x128xf32, #tpu.memory_space<vmem>> -> memref<1x128xf32, #tpu.memory_space<vmem>>
    %113 = tpu.memref_slice %arg4[%110] : memref<8x!tpu.dma_semaphore, #tpu.memory_space<semaphore_mem>> -> memref<1x!tpu.dma_semaphore, #tpu.memory_space<semaphore_mem>>
    %114 = tpu.memref_squeeze %113 : memref<1x!tpu.dma_semaphore, #tpu.memory_space<semaphore_mem>> -> memref<!tpu.dma_semaphore, #tpu.memory_space<semaphore_mem>>
    tpu.enqueue_dma source(%111 : memref<1x128xf32, #tpu.memory_space<any>>) target(%112 : memref<1x128xf32, #tpu.memory_space<vmem>>) target_semaphore(%114 : memref<!tpu.dma_semaphore, #tpu.memory_space<semaphore_mem>>)
    %c6_i32 = arith.constant 6 : i32
    %c1_i32_59 = arith.constant 1 : i32
    %115 = arith.muli %c6_i32, %c1_i32_59 : i32
    %c0_i32_60 = arith.constant 0 : i32
    %116 = arith.addi %c0_i32_60, %115 : i32
    %117 = arith.addi %0, %116 : i32
    %118 = arith.index_cast %117 : i32 to index
    %119 = memref.load %arg1[%118] : memref<16xi32, #tpu.memory_space<smem>>
    %c8_i32_61 = arith.constant 8 : i32
    %c0_i32_62 = arith.constant 0 : i32
    %120 = arith.cmpi eq, %c8_i32_61, %c0_i32_62 : i32
    %c1_i32_63 = arith.constant 1 : i32
    %121 = arith.select %120, %c1_i32_63, %c8_i32_61 : i32
    %122 = arith.remsi %116, %121 : i32
    %c0_i32_64 = arith.constant 0 : i32
    %123 = arith.cmpi ne, %122, %c0_i32_64 : i32
    %c0_i32_65 = arith.constant 0 : i32
    %124 = arith.cmpi slt, %122, %c0_i32_65 : i32
    %c0_i32_66 = arith.constant 0 : i32
    %125 = arith.cmpi slt, %121, %c0_i32_66 : i32
    %126 = arith.xori %124, %125 : i1
    %127 = arith.andi %126, %123 : i1
    %128 = arith.addi %122, %121 : i32
    %129 = arith.select %127, %128, %122 : i32
    %c0_i32_67 = arith.constant 0 : i32
    %130 = tpu.memref_slice %arg2[%119, %c0_i32_67] : memref<256x128xf32, #tpu.memory_space<any>> -> memref<1x128xf32, #tpu.memory_space<any>>
    %c0_i32_68 = arith.constant 0 : i32
    %131 = tpu.memref_slice %arg3[%116, %c0_i32_68] : memref<16x128xf32, #tpu.memory_space<vmem>> -> memref<1x128xf32, #tpu.memory_space<vmem>>
    %132 = tpu.memref_slice %arg4[%129] : memref<8x!tpu.dma_semaphore, #tpu.memory_space<semaphore_mem>> -> memref<1x!tpu.dma_semaphore, #tpu.memory_space<semaphore_mem>>
    %133 = tpu.memref_squeeze %132 : memref<1x!tpu.dma_semaphore, #tpu.memory_space<semaphore_mem>> -> memref<!tpu.dma_semaphore, #tpu.memory_space<semaphore_mem>>
    tpu.enqueue_dma source(%130 : memref<1x128xf32, #tpu.memory_space<any>>) target(%131 : memref<1x128xf32, #tpu.memory_space<vmem>>) target_semaphore(%133 : memref<!tpu.dma_semaphore, #tpu.memory_space<semaphore_mem>>)
    %c7_i32 = arith.constant 7 : i32
    %c1_i32_69 = arith.constant 1 : i32
    %134 = arith.muli %c7_i32, %c1_i32_69 : i32
    %c0_i32_70 = arith.constant 0 : i32
    %135 = arith.addi %c0_i32_70, %134 : i32
    %136 = arith.addi %0, %135 : i32
    %137 = arith.index_cast %136 : i32 to index
    %138 = memref.load %arg1[%137] : memref<16xi32, #tpu.memory_space<smem>>
    %c8_i32_71 = arith.constant 8 : i32
    %c0_i32_72 = arith.constant 0 : i32
    %139 = arith.cmpi eq, %c8_i32_71, %c0_i32_72 : i32
    %c1_i32_73 = arith.constant 1 : i32
    %140 = arith.select %139, %c1_i32_73, %c8_i32_71 : i32
    %141 = arith.remsi %135, %140 : i32
    %c0_i32_74 = arith.constant 0 : i32
    %142 = arith.cmpi ne, %141, %c0_i32_74 : i32
    %c0_i32_75 = arith.constant 0 : i32
    %143 = arith.cmpi slt, %141, %c0_i32_75 : i32
    %c0_i32_76 = arith.constant 0 : i32
    %144 = arith.cmpi slt, %140, %c0_i32_76 : i32
    %145 = arith.xori %143, %144 : i1
    %146 = arith.andi %145, %142 : i1
    %147 = arith.addi %141, %140 : i32
    %148 = arith.select %146, %147, %141 : i32
    %c0_i32_77 = arith.constant 0 : i32
    %149 = tpu.memref_slice %arg2[%138, %c0_i32_77] : memref<256x128xf32, #tpu.memory_space<any>> -> memref<1x128xf32, #tpu.memory_space<any>>
    %c0_i32_78 = arith.constant 0 : i32
    %150 = tpu.memref_slice %arg3[%135, %c0_i32_78] : memref<16x128xf32, #tpu.memory_space<vmem>> -> memref<1x128xf32, #tpu.memory_space<vmem>>
    %151 = tpu.memref_slice %arg4[%148] : memref<8x!tpu.dma_semaphore, #tpu.memory_space<semaphore_mem>> -> memref<1x!tpu.dma_semaphore, #tpu.memory_space<semaphore_mem>>
    %152 = tpu.memref_squeeze %151 : memref<1x!tpu.dma_semaphore, #tpu.memory_space<semaphore_mem>> -> memref<!tpu.dma_semaphore, #tpu.memory_space<semaphore_mem>>
    tpu.enqueue_dma source(%149 : memref<1x128xf32, #tpu.memory_space<any>>) target(%150 : memref<1x128xf32, #tpu.memory_space<vmem>>) target_semaphore(%152 : memref<!tpu.dma_semaphore, #tpu.memory_space<semaphore_mem>>)
    %c8_i32_79 = arith.constant 8 : i32
    %c0_i32_80 = arith.constant 0 : i32
    %c16_i32_81 = arith.constant 16 : i32
    %153 = arith.addi %c0_i32_80, %c16_i32_81 : i32
    %c1_i32_82 = arith.constant 1 : i32
    scf.for %arg5 = %c0_i32_80 to %153 step %c1_i32_82  : i32 {
      %c1_i32_84 = arith.constant 1 : i32
      %154 = arith.muli %arg5, %c1_i32_84 : i32
      %c0_i32_85 = arith.constant 0 : i32
      %155 = arith.addi %c0_i32_85, %154 : i32
      %c8_i32_86 = arith.constant 8 : i32
      %156 = arith.addi %155, %c8_i32_86 : i32
      %c15_i32 = arith.constant 15 : i32
      %157 = arith.minsi %156, %c15_i32 : i32
      %158 = arith.addi %0, %157 : i32
      %159 = arith.index_cast %158 : i32 to index
      %160 = memref.load %arg1[%159] : memref<16xi32, #tpu.memory_space<smem>>
      %c8_i32_87 = arith.constant 8 : i32
      %c0_i32_88 = arith.constant 0 : i32
      %161 = arith.cmpi eq, %c8_i32_87, %c0_i32_88 : i32
      %c1_i32_89 = arith.constant 1 : i32
      %162 = arith.select %161, %c1_i32_89, %c8_i32_87 : i32
      %163 = arith.remsi %155, %162 : i32
      %c0_i32_90 = arith.constant 0 : i32
      %164 = arith.cmpi ne, %163, %c0_i32_90 : i32
      %c0_i32_91 = arith.constant 0 : i32
      %165 = arith.cmpi slt, %163, %c0_i32_91 : i32
      %c0_i32_92 = arith.constant 0 : i32
      %166 = arith.cmpi slt, %162, %c0_i32_92 : i32
      %167 = arith.xori %165, %166 : i1
      %168 = arith.andi %167, %164 : i1
      %169 = arith.addi %163, %162 : i32
      %170 = arith.select %168, %169, %163 : i32
      %c0_i32_93 = arith.constant 0 : i32
      %c0_i32_94 = arith.constant 0 : i32
      %171 = tpu.memref_slice %arg2[%c0_i32_93, %c0_i32_94] : memref<256x128xf32, #tpu.memory_space<any>> -> memref<1x128xf32, #tpu.memory_space<any>>
      %c0_i32_95 = arith.constant 0 : i32
      %172 = tpu.memref_slice %arg3[%155, %c0_i32_95] : memref<16x128xf32, #tpu.memory_space<vmem>> -> memref<1x128xf32, #tpu.memory_space<vmem>>
      %173 = tpu.memref_slice %arg4[%170] : memref<8x!tpu.dma_semaphore, #tpu.memory_space<semaphore_mem>> -> memref<1x!tpu.dma_semaphore, #tpu.memory_space<semaphore_mem>>
      %174 = tpu.memref_squeeze %173 : memref<1x!tpu.dma_semaphore, #tpu.memory_space<semaphore_mem>> -> memref<!tpu.dma_semaphore, #tpu.memory_space<semaphore_mem>>
      tpu.wait_dma2 semaphore(%174 : memref<!tpu.dma_semaphore, #tpu.memory_space<semaphore_mem>>) src(%171 : memref<1x128xf32, #tpu.memory_space<any>>) dst(%172 : memref<1x128xf32, #tpu.memory_space<vmem>>)
      %c16_i32_96 = arith.constant 16 : i32
      %175 = arith.cmpi slt, %156, %c16_i32_96 : i32
      %176 = arith.extui %175 : i1 to i32
      %c0_i32_97 = arith.constant 0 : i32
      %177 = arith.cmpi ne, %176, %c0_i32_97 : i32
      scf.if %177 {
        %c8_i32_98 = arith.constant 8 : i32
        %c0_i32_99 = arith.constant 0 : i32
        %178 = arith.cmpi eq, %c8_i32_98, %c0_i32_99 : i32
        %c1_i32_100 = arith.constant 1 : i32
        %179 = arith.select %178, %c1_i32_100, %c8_i32_98 : i32
        %180 = arith.remsi %156, %179 : i32
        %c0_i32_101 = arith.constant 0 : i32
        %181 = arith.cmpi ne, %180, %c0_i32_101 : i32
        %c0_i32_102 = arith.constant 0 : i32
        %182 = arith.cmpi slt, %180, %c0_i32_102 : i32
        %c0_i32_103 = arith.constant 0 : i32
        %183 = arith.cmpi slt, %179, %c0_i32_103 : i32
        %184 = arith.xori %182, %183 : i1
        %185 = arith.andi %184, %181 : i1
        %186 = arith.addi %180, %179 : i32
        %187 = arith.select %185, %186, %180 : i32
        %c0_i32_104 = arith.constant 0 : i32
        %188 = tpu.memref_slice %arg2[%160, %c0_i32_104] : memref<256x128xf32, #tpu.memory_space<any>> -> memref<1x128xf32, #tpu.memory_space<any>>
        %c0_i32_105 = arith.constant 0 : i32
        %189 = tpu.memref_slice %arg3[%156, %c0_i32_105] : memref<16x128xf32, #tpu.memory_space<vmem>> -> memref<1x128xf32, #tpu.memory_space<vmem>>
        %190 = tpu.memref_slice %arg4[%187] : memref<8x!tpu.dma_semaphore, #tpu.memory_space<semaphore_mem>> -> memref<1x!tpu.dma_semaphore, #tpu.memory_space<semaphore_mem>>
        %191 = tpu.memref_squeeze %190 : memref<1x!tpu.dma_semaphore, #tpu.memory_space<semaphore_mem>> -> memref<!tpu.dma_semaphore, #tpu.memory_space<semaphore_mem>>
        tpu.enqueue_dma source(%188 : memref<1x128xf32, #tpu.memory_space<any>>) target(%189 : memref<1x128xf32, #tpu.memory_space<vmem>>) target_semaphore(%191 : memref<!tpu.dma_semaphore, #tpu.memory_space<semaphore_mem>>)
      } else {
      }
    }
    %c16_i32_83 = arith.constant 16 : i32
    return
  }
  func.func @transform_1(%arg0: i32, %arg1: memref<16xi32, #tpu.memory_space<smem>>) -> (i32, i32) {
    %c0_i32 = arith.constant 0 : i32
    %c0_i32_0 = arith.constant 0 : i32
    return %arg0, %c0_i32 : i32, i32
  }
}

</mosaic_0001>

<bundles_post_ra>
// kernel: tpu_custom_call.1
= control target key start
LH: loop header
LB: loop body
LE: loop exit
PB: predicated region body
PF: predicated region fallthrough
CT: control target
= control target key end

     0   :  { %s846_s0 = inlined_call_operand.hbm [shape: s32[16], index: 0, kind: input, shape index: {}]   ;;  %s847_s1 = inlined_call_operand.hbm [shape: f32[256,128], index: 1, kind: input, shape index: {}]   ;;  %s848_s2 = inlined_call_operand.hbm [shape: f32[16,128], index: 2, kind: output, shape index: {}]  }
   0x1   :  { %s355_s11 = scalar_lea.hbm %s846_s0, 16 }
   0x2   :  { %p356_p0 = scmp.ne.s32.totalorder %s846_s0, %s355_s11  ;;  %p359_p1 = scmp.lt.u32.totalorder %s355_s11, %s846_s0 }
   0x4   :  { %p361_p2 = pnand %p359_p1, %p356_p0 }
   0x6   :  { %364 = shalt.err (!%p361_p2)  }
   0x7   :  { %s621_s16 = smov [#allocation4]  }
   0x8   :  { %8 = dma.hbm_to_smem %s846_s0, 16, %s621_s16, [#allocation3] }
   0x9   :  { %611 = dma.done.wait [#allocation3], 16 }
   0xa   :  { %612 = vsyncadd [#allocation3], 4294967280 }
   0xb   :  { %10 = sfence }
   0xc   :  { %11 = vsyncpa [#allocation6], 0  ;;  %s13_s19 = sld [smem:[#allocation4]]  ;;  %s622_s20 = smov [#allocation5]  }
   0xd   :  { %s23_s21 = sshll.u32 %s622_s20, 4  ;;  %s659_s22 = sld [smem:[#allocation4 + $0x1]]  ;;  %s661_s21 = int_to_ptr.vmem [resolvable:$true] %s23_s21 }
   0xe   :  { %s623_s23 = smov [#allocation5 + $0x1]   ;;  %s663_s25 = sld [smem:[#allocation4 + $0x2]] }
   0xf   :  { %s40_s24 = sshll.u32 %s623_s23, 4  ;;  %s624_s26 = smov [#allocation5 + $0x2]   ;;  %s665_s24 = int_to_ptr.vmem [resolvable:$true] %s40_s24 }
  0x10   :  { %s57_s0 = sshll.u32 %s624_s26, 4  ;;  %s667_s27 = sld [smem:[#allocation4 + $0x3]]  ;;  %s669_s0 = int_to_ptr.vmem [resolvable:$true] %s57_s0 }
  0x11   :  { %s678_s8 = scalar_lea.hbm %s847_s1, 4096 }
  0x12   :  { %s302_s28 = sshll.u32 %s13_s19, 4 }
  0x13   :  { %s15_s3 = scalar_lea.hbm %s847_s1, %s302_s28  ;;  %s304_s4 = sshll.u32 %s659_s22, 4 }
  0x14   :  { %s365_s5 = scalar_lea.hbm %s15_s3, 16  ;;  %p368_p4 = scmp.lt.u32.totalorder %s15_s3, %s847_s1 }
  0x15   :  { %p366_p3 = scmp.ne.s32.totalorder %s15_s3, %s365_s5  ;;  %p369_p5 = scmp.lt.u32.totalorder %s678_s8, %s365_s5 }
  0x16   :  { %p371_p7 = scmp.lt.u32.totalorder %s365_s5, %s15_s3 }
  0x17   :  { %p370_p6 = por %p369_p5, %p368_p4 }
  0x19   :  { %p372_p8 = por %p371_p7, %p370_p6 }
  0x1b   :  { %p373_p9 = pnand %p372_p8, %p366_p3 }
  0x1d   :  { %376 = shalt.err (!%p373_p9)  }
  0x1e   :  { %s377_s11 = scalar_lea.vmem %s661_s21, 16  ;;  %s687_s12 = scalar_lea.vmem %s661_s21, 256 }
  0x1f   :  { %p378_p10 = scmp.ne.s32.totalorder %s661_s21, %s377_s11  ;;  %p849_p11 = scmp.lt.s32.totalorder %s661_s21, %s661_s21 }
  0x20   :  { %p383_p12 = scmp.lt.s32.totalorder %s687_s12, %s377_s11 }
  0x22   :  { %p384_p13 = por %p383_p12, %p849_p11 }
  0x24   :  { %p385_p0 = pnand %p384_p13, %p378_p10 }
  0x26   :  { %388 = shalt.err (!%p385_p0)  }
  0x27   :  { %26 = dma.hbm_to_vmem [thread:$0]  %s15_s3, 16, %s661_s21, [#allocation2] }
  0x28   :  { %s30_s15 = scalar_lea.hbm %s847_s1, %s304_s4  ;;  %s306_s16 = sshll.u32 %s663_s25, 4 }
  0x29   :  { %s389_s17 = scalar_lea.hbm %s30_s15, 16  ;;  %p392_p2 = scmp.lt.u32.totalorder %s30_s15, %s847_s1 }
  0x2a   :  { %p390_p1 = scmp.ne.s32.totalorder %s30_s15, %s389_s17  ;;  %p393_p3 = scmp.lt.u32.totalorder %s678_s8, %s389_s17 }
  0x2b   :  { %p395_p5 = scmp.lt.u32.totalorder %s389_s17, %s30_s15 }
  0x2c   :  { %p394_p4 = por %p393_p3, %p392_p2 }
  0x2e   :  { %p396_p6 = por %p395_p5, %p394_p4 }
  0x30   :  { %p397_p7 = pnand %p396_p6, %p390_p1 }
  0x32   :  { %400 = shalt.err (!%p397_p7)  }
  0x33   :  { %s401_s20 = scalar_lea.vmem %s665_s24, 16  ;;  %p406_p9 = scmp.lt.s32.totalorder %s665_s24, %s661_s21 }
  0x34   :  { %p402_p8 = scmp.ne.s32.totalorder %s665_s24, %s401_s20  ;;  %p407_p10 = scmp.lt.s32.totalorder %s687_s12, %s401_s20 }
  0x36   :  { %p408_p12 = por %p407_p10, %p406_p9 }
  0x38   :  { %p409_p13 = pnand %p408_p12, %p402_p8 }
  0x3a   :  { %412 = shalt.err (!%p409_p13)  }
  0x3b   :  { %43 = dma.hbm_to_vmem [thread:$0]  %s30_s15, 16, %s665_s24, [#allocation2 + $0x1] }
  0x3c   :  { %s47_s25 = scalar_lea.hbm %s847_s1, %s306_s16  ;;  %s308_s26 = sshll.u32 %s667_s27, 4 }
  0x3d   :  { %s413_s28 = scalar_lea.hbm %s47_s25, 16  ;;  %p416_p1 = scmp.lt.u32.totalorder %s47_s25, %s847_s1 }
  0x3e   :  { %p414_p0 = scmp.ne.s32.totalorder %s47_s25, %s413_s28  ;;  %p417_p2 = scmp.lt.u32.totalorder %s678_s8, %s413_s28 }
  0x3f   :  { %p419_p4 = scmp.lt.u32.totalorder %s413_s28, %s47_s25 }
  0x40   :  { %p418_p3 = por %p417_p2, %p416_p1 }
  0x42   :  { %p420_p5 = por %p419_p4, %p418_p3 }
  0x44   :  { %p421_p6 = pnand %p420_p5, %p414_p0 }
  0x46   :  { %424 = shalt.err (!%p421_p6)  }
  0x47   :  { %s425_s24 = scalar_lea.vmem %s669_s0, 16  ;;  %p430_p8 = scmp.lt.s32.totalorder %s669_s0, %s661_s21 }
  0x48   :  { %p426_p7 = scmp.ne.s32.totalorder %s669_s0, %s425_s24  ;;  %p431_p9 = scmp.lt.s32.totalorder %s687_s12, %s425_s24 }
  0x4a   :  { %p432_p10 = por %p431_p9, %p430_p8 }
  0x4c   :  { %p433_p12 = pnand %p432_p10, %p426_p7 }
  0x4e   :  { %436 = shalt.err (!%p433_p12)  }
  0x4f   :  { %60 = dma.hbm_to_vmem [thread:$0]  %s47_s25, 16, %s669_s0, [#allocation2 + $0x2] }
  0x50   :  { %s64_s4 = scalar_lea.hbm %s847_s1, %s308_s26  ;;  %s625_s5 = smov [#allocation5 + $0x3]  }
  0x51   :  { %s74_s6 = sshll.u32 %s625_s5, 4  ;;  %s727_s7 = sld [smem:[#allocation4 + $0x4]]  ;;  %s75_s6 = int_to_ptr.vmem [resolvable:$true] %s74_s6 }
  0x52   :  { %s437_s9 = scalar_lea.hbm %s64_s4, 16  ;;  %p440_p0 = scmp.lt.u32.totalorder %s64_s4, %s847_s1 }
  0x53   :  { %p438_p13 = scmp.ne.s32.totalorder %s64_s4, %s437_s9  ;;  %p441_p1 = scmp.lt.u32.totalorder %s678_s8, %s437_s9 }
  0x54   :  { %p443_p3 = scmp.lt.u32.totalorder %s437_s9, %s64_s4 }
  0x55   :  { %p442_p2 = por %p441_p1, %p440_p0 }
  0x57   :  { %p444_p4 = por %p443_p3, %p442_p2 }
  0x59   :  { %p445_p5 = pnand %p444_p4, %p438_p13 }
  0x5b   :  { %448 = shalt.err (!%p445_p5)  }
  0x5c   :  { %s449_s0 = scalar_lea.vmem %s75_s6, 16  ;;  %p454_p7 = scmp.lt.s32.totalorder %s75_s6, %s661_s21 }
  0x5d   :  { %p450_p6 = scmp.ne.s32.totalorder %s75_s6, %s449_s0  ;;  %p455_p8 = scmp.lt.s32.totalorder %s687_s12, %s449_s0 }
  0x5f   :  { %p456_p9 = por %p455_p8, %p454_p7 }
  0x61   :  { %p457_p10 = pnand %p456_p9, %p450_p6 }
  0x63   :  { %460 = shalt.err (!%p457_p10)  }
  0x64   :  { %77 = dma.hbm_to_vmem [thread:$0]  %s64_s4, 16, %s75_s6, [#allocation2 + $0x3] }
  0x65   :  { %s626_s13 = smov [#allocation5 + $0x4]   ;;  %s735_s15 = sld [smem:[#allocation4 + $0x5]] }
  0x66   :  { %s91_s14 = sshll.u32 %s626_s13, 4  ;;  %s627_s16 = smov [#allocation5 + $0x5]   ;;  %s92_s14 = int_to_ptr.vmem [resolvable:$true] %s91_s14 }
  0x67   :  { %s108_s17 = sshll.u32 %s627_s16, 4  ;;  %s737_s18 = sld [smem:[#allocation4 + $0x6]]  ;;  %s740_s17 = int_to_ptr.vmem [resolvable:$true] %s108_s17 }
  0x68   :  { %s310_s19 = sshll.u32 %s727_s7, 4 }
  0x69   :  { %s81_s23 = scalar_lea.hbm %s847_s1, %s310_s19 }
  0x6a   :  { %s461_s25 = scalar_lea.hbm %s81_s23, 16  ;;  %p464_p13 = scmp.lt.u32.totalorder %s81_s23, %s847_s1 }
  0x6b   :  { %p462_p12 = scmp.ne.s32.totalorder %s81_s23, %s461_s25  ;;  %p465_p0 = scmp.lt.u32.totalorder %s678_s8, %s461_s25 }
  0x6c   :  { %p467_p2 = scmp.lt.u32.totalorder %s461_s25, %s81_s23 }
  0x6d   :  { %p466_p1 = por %p465_p0, %p464_p13 }
  0x6f   :  { %p468_p3 = por %p467_p2, %p466_p1 }
  0x71   :  { %p469_p4 = pnand %p468_p3, %p462_p12 }
  0x73   :  { %472 = shalt.err (!%p469_p4)  }
  0x74   :  { %s473_s29 = scalar_lea.vmem %s92_s14, 16  ;;  %p478_p6 = scmp.lt.s32.totalorder %s92_s14, %s661_s21 }
  0x75   :  { %p474_p5 = scmp.ne.s32.totalorder %s92_s14, %s473_s29  ;;  %p479_p7 = scmp.lt.s32.totalorder %s687_s12, %s473_s29 }
  0x77   :  { %p480_p8 = por %p479_p7, %p478_p6 }
  0x79   :  { %p481_p9 = pnand %p480_p8, %p474_p5 }
  0x7b   :  { %484 = shalt.err (!%p481_p9)  }
  0x7c   :  { %94 = dma.hbm_to_vmem [thread:$0]  %s81_s23, 16, %s92_s14, [#allocation2 + $0x4] }
  0x7d   :  { %s312_s30 = sshll.u32 %s735_s15, 4  ;;  %s628_s24 = smov [#allocation5 + $0x6]  }
  0x7e   :  { %s125_s27 = sshll.u32 %s628_s24, 4  ;;  %s98_s5 = scalar_lea.hbm %s847_s1, %s312_s30  ;;  %s755_s27 = int_to_ptr.vmem [resolvable:$true] %s125_s27 }
  0x7f   :  { %s485_s6 = scalar_lea.hbm %s98_s5, 16  ;;  %p488_p12 = scmp.lt.u32.totalorder %s98_s5, %s847_s1 }
  0x80   :  { %p486_p10 = scmp.ne.s32.totalorder %s98_s5, %s485_s6  ;;  %p489_p13 = scmp.lt.u32.totalorder %s678_s8, %s485_s6 }
  0x81   :  { %p491_p1 = scmp.lt.u32.totalorder %s485_s6, %s98_s5 }
  0x82   :  { %p490_p0 = por %p489_p13, %p488_p12 }
  0x84   :  { %p492_p2 = por %p491_p1, %p490_p0 }
  0x86   :  { %p493_p3 = pnand %p492_p2, %p486_p10 }
  0x88   :  { %496 = shalt.err (!%p493_p3)  }
  0x89   :  { %s497_s10 = scalar_lea.vmem %s740_s17, 16  ;;  %p502_p5 = scmp.lt.s32.totalorder %s740_s17, %s661_s21 }
  0x8a   :  { %p498_p4 = scmp.ne.s32.totalorder %s740_s17, %s497_s10  ;;  %p503_p6 = scmp.lt.s32.totalorder %s687_s12, %s497_s10 }
  0x8c   :  { %p504_p7 = por %p503_p6, %p502_p5 }
  0x8e   :  { %p505_p8 = pnand %p504_p7, %p498_p4 }
  0x90   :  { %508 = shalt.err (!%p505_p8)  }
  0x91   :  { %111 = dma.hbm_to_vmem [thread:$0]  %s98_s5, 16, %s740_s17, [#allocation2 + $0x5] }
  0x92   :  { %s314_s11 = sshll.u32 %s737_s18, 4  ;;  %s315_s0 = sld [smem:[#allocation4 + $0x7]] }
  0x93   :  { %s115_s15 = scalar_lea.hbm %s847_s1, %s314_s11 }
  0x94   :  { %s509_s16 = scalar_lea.hbm %s115_s15, 16  ;;  %p512_p10 = scmp.lt.u32.totalorder %s115_s15, %s847_s1 }
  0x95   :  { %p510_p9 = scmp.ne.s32.totalorder %s115_s15, %s509_s16  ;;  %p513_p12 = scmp.lt.u32.totalorder %s678_s8, %s509_s16 }
  0x96   :  { %p515_p0 = scmp.lt.u32.totalorder %s509_s16, %s115_s15 }
  0x97   :  { %p514_p13 = por %p513_p12, %p512_p10 }
  0x99   :  { %p516_p1 = por %p515_p0, %p514_p13 }
  0x9b   :  { %p517_p2 = pnand %p516_p1, %p510_p9 }
  0x9d   :  { %520 = shalt.err (!%p517_p2)  }
  0x9e   :  { %s521_s17 = scalar_lea.vmem %s755_s27, 16  ;;  %p526_p4 = scmp.lt.s32.totalorder %s755_s27, %s661_s21 }
  0x9f   :  { %p522_p3 = scmp.ne.s32.totalorder %s755_s27, %s521_s17  ;;  %p527_p5 = scmp.lt.s32.totalorder %s687_s12, %s521_s17 }
  0xa1   :  { %p528_p6 = por %p527_p5, %p526_p4 }
  0xa3   :  { %p529_p7 = pnand %p528_p6, %p522_p3 }
  0xa5   :  { %532 = shalt.err (!%p529_p7)  }
  0xa6   :  { %128 = dma.hbm_to_vmem [thread:$0]  %s115_s15, 16, %s755_s27, [#allocation2 + $0x6] }
  0xa7   :  { %s629_s18 = smov [#allocation5 + $0x7]   ;;  %s316_s23 = sshll.u32 %s315_s0, 4 }
  0xa8   :  { %s142_s22 = sshll.u32 %s629_s18, 4  ;;  %s132_s28 = scalar_lea.hbm %s847_s1, %s316_s23  ;;  %s143_s22 = int_to_ptr.vmem [resolvable:$true] %s142_s22 }
  0xa9   :  { %s533_s29 = scalar_lea.hbm %s132_s28, 16  ;;  %p536_p9 = scmp.lt.u32.totalorder %s132_s28, %s847_s1 }
  0xaa   :  { %p534_p8 = scmp.ne.s32.totalorder %s132_s28, %s533_s29  ;;  %p537_p10 = scmp.lt.u32.totalorder %s678_s8, %s533_s29 }
  0xab   :  { %p539_p13 = scmp.lt.u32.totalorder %s533_s29, %s132_s28 }
  0xac   :  { %p538_p12 = por %p537_p10, %p536_p9 }
  0xae   :  { %p540_p0 = por %p539_p13, %p538_p12 }
  0xb0   :  { %p541_p1 = pnand %p540_p0, %p534_p8 }
  0xb2   :  { %544 = shalt.err (!%p541_p1)  }
  0xb3   :  { %s545_s27 = scalar_lea.vmem %s143_s22, 16  ;;  %p550_p3 = scmp.lt.s32.totalorder %s143_s22, %s661_s21 }
  0xb4   :  { %p546_p2 = scmp.ne.s32.totalorder %s143_s22, %s545_s27  ;;  %p551_p4 = scmp.lt.s32.totalorder %s687_s12, %s545_s27 }
  0xb6   :  { %p552_p5 = por %p551_p4, %p550_p3 }
  0xb8   :  { %p553_p6 = pnand %p552_p5, %p546_p2 }
  0xba   :  { %556 = shalt.err (!%p553_p6)  }
  0xbb   :  { %145 = dma.hbm_to_vmem [thread:$0]  %s132_s28, 16, %s143_s22, [#allocation2 + $0x7] }
  0xbc   :  { %s790_s3 = smov 0  }
  0xbd LB: > { %s796_s4 = sadd.s32 8, %s619_s3  ;;  %s158_s5 = ssub.s32 0, %s619_s3  ;;  %s619_s3 = sphi %s790_s3, %s151_s3  }
  0xbe   : > { %p153_p7 = scmp.lt.s32.totalorder %s796_s4, 15  ;;  %p157_p8 = scmp.lt.s32.totalorder %s619_s3, 0 }
  0xbf   : > { %s317_s6 = smin.u32 %s619_s3, %s158_s5 }
  0xc0   : > { %s154_s7 = scalar_select %p153_p7, %s796_s4, 15 }
  0xc1   : > { %s160_s9 = sand.u32 7, %s317_s6  }
  0xc2   : > { %s156_s10 = sld [smem:[#allocation4 + %s154_s7]]  ;;  %s161_s11 = ssub.s32 0, %s160_s9 }
  0xc3   : > { %s852_s11 = smov (!%p157_p8, %s161_s11), %s160_s9 }
  0xc4   : > { %p319_p9 = scmp.lt.s32.totalorder %s852_s11, 0  ;;  %s167_s0 = sadd.s32 8, %s852_s11 }
  0xc6   : > { %s854_s0 = smov (!%p319_p9, %s167_s0), %s852_s11 }
  0xc7   : > { %s169_s13 = scalar_lea.sflag [#allocation2], %s854_s0 }
  0xc8   : > { %613 = dma.done.wait %s169_s13, 16 }
  0xc9   : > { %614 = vsyncadd %s169_s13, 4294967280  ;;  %p177_p10 = scmp.lt.s32.totalorder %s796_s4, 0  ;;  %s178_s14 = ssub.s32 0, %s796_s4 }
  0xca   : > { %s321_s15 = smin.u32 %s178_s14, %s796_s4  ;;  %s324_s19 = sshll.u32 %s156_s10, 4 }
  0xcb   : > { %s180_s16 = sand.u32 7, %s321_s15   ;;  %p335_p12 = scmp.lt.s32.totalorder %s796_s4, 16 }
  0xcc   : > { %s181_s20 = ssub.s32 0, %s180_s16  ;;  %s294_s17 = scalar_lea.vmem [#allocation5], %s619_s3 }
  0xcd   : > { %s856_s20 = smov (!%p177_p10, %s181_s20), %s180_s16  ;;  %s295_s18 = scalar_lea.vmem %s294_s17, 8 [#allocation5] }
  0xce   : > { %p323_p13 = scmp.lt.s32.totalorder %s856_s20, 0  ;;  %s187_s22 = sadd.s32 8, %s856_s20 }
  0xcf   : > { %s190_s26 = scalar_lea.hbm %s847_s1, %s324_s19  ;;  %s200_s28 = sshll.u32 %s295_s18, 4  ;;  %s201_s28 = int_to_ptr.vmem [resolvable:$true] %s200_s28 }
  0xd0   : > { %s858_s22 = smov (!%p323_p13, %s187_s22), %s856_s20  ;;  %s557_s30 = scalar_lea.hbm %s190_s26, 16 }
  0xd1   : > { %s192_s29 = scalar_lea.sflag [#allocation2], %s858_s22  ;;  %p558_p0 = scmp.ne.s32.totalorder %s190_s26, %s557_s30 }
  0xd2   : > { %p562_p3 = scmp.lt.u32.totalorder %s190_s26, %s847_s1  ;;  %p563_p4 = scmp.lt.u32.totalorder %s678_s8, %s557_s30 }
  0xd3   : > { %p559_p1 = pnand %p558_p0, %p335_p12  ;;  %p565_p6 = scmp.lt.u32.totalorder %s557_s30, %s190_s26 }
  0xd4   : > { %p564_p5 = por %p563_p4, %p562_p3 }
  0xd5   : > { %p560_p2 = pneg %p559_p1 }
  0xd6   : > { %p566_p7 = por %p565_p6, %p564_p5 }
  0xd8   : > { %p567_p8 = pnand %p566_p7, %p560_p2 }
  0xda   : > { %570 = shalt.err (!%p567_p8)  }
  0xdb   : > { %s571_s5 = scalar_lea.vmem %s201_s28, 16  ;;  %p578_p0 = scmp.lt.s32.totalorder %s201_s28, %s661_s21 }
  0xdc   : > { %p572_p9 = scmp.ne.s32.totalorder %s201_s28, %s571_s5  ;;  %p579_p1 = scmp.lt.s32.totalorder %s687_s12, %s571_s5 }
  0xde   : > { %p573_p10 = pnand %p572_p9, %p335_p12  ;;  %p580_p11 = por %p579_p1, %p578_p0 }
  0xe0   : > { %p574_p13 = pneg %p573_p10 }
  0xe2   : > { %p581_p3 = pnand %p580_p11, %p574_p13 }
  0xe4   : > { %584 = shalt.err (!%p581_p3)  }
  0xe5   : > { %334 = dma.hbm_to_vmem [thread:$0]  (%p335_p12), %s190_s26, 16, %s201_s28, %s192_s29 }
  0xe6   : > { %s151_s3 = sadd.s32 1, %s619_s3  }
  0xe7   : > { %p148_p2 = scmp.ge.s32.totalorder %s151_s3, 16  }
  0xe8   :  { %p586_p4 = scmp.ne.s32.totalorder (%p148_p2), %s661_s21, %s687_s12  ;;  %p591_p5 = scmp.lt.s32.totalorder (%p148_p2), %s687_s12, %s687_s12 }
  0xe9   :  { %150 = sbr.rel (!%p148_p2) target bundleno = 189 (0xbd), region = 100  ;;  %p850_p6 = scmp.lt.s32.totalorder (%p148_p2), %s661_s21, %s661_s21 }
  0xeb   :  { %p592_p11 = por (%p148_p2), %p591_p5, %p850_p6 }
  0xed   :  { %p593_p7 = pnand (%p148_p2), %p592_p11, %p586_p4 }
  0xf0   :  { %596 = shalt.err (!%p593_p7)
}
  0xf1   :  { %s597_s7 = scalar_lea.hbm %s848_s2, 256 }
  0xf2   :  { %p598_p12 = scmp.ne.s32.totalorder %s848_s2, %s597_s7  ;;  %p601_p8 = scmp.lt.u32.totalorder %s597_s7, %s848_s2 }
  0xf4   :  { %p603_p9 = pnand %p601_p8, %p598_p12 }
  0xf6   :  { %606 = shalt.err (!%p603_p9)
}
  0xf7   :  { %s630_s3 = smov 128   ;;  %s631_s12 = smov 8  }
  0xf8   :  { %215 = dma.vmem_to_hbm [thread:$0]  %s661_s21, 256, %s848_s2, [#allocation6], %s630_s3, %s630_s3, %s631_s12  }
  0xf9   :  { %615 = dma.done.wait [#allocation6], 256  }
  0xfa   :  { %616 = vsyncadd [#allocation6], 4294967040 }
  0xfb   :  { %219 = vsyncpa [#allocation6], 1 }
  0xfc   :  { %220 = vsyncmov [#allocation2] }
  0xff   :  { %s221_s13 = vpop.sfrf %220 }
 0x100   :  { %p325_p10 = scmp.ne.s32.totalorder %s221_s13, 0 }
 0x102   :  { %225 = shalt.err (%p325_p10)  }
 0x103   :  { %227 = vsyncmov [#allocation2 + $0x1] }
 0x106   :  { %s228_s14 = vpop.sfrf %227 }
 0x107   :  { %p326_p13 = scmp.ne.s32.totalorder %s228_s14, 0 }
 0x109   :  { %232 = shalt.err (%p326_p13)  }
 0x10a   :  { %234 = vsyncmov [#allocation2 + $0x2] }
 0x10d   :  { %s235_s15 = vpop.sfrf %234 }
 0x10e   :  { %p327_p0 = scmp.ne.s32.totalorder %s235_s15, 0 }
 0x110   :  { %239 = shalt.err (%p327_p0)  }
 0x111   :  { %241 = vsyncmov [#allocation2 + $0x3] }
 0x114   :  { %s242_s16 = vpop.sfrf %241 }
 0x115   :  { %p328_p1 = scmp.ne.s32.totalorder %s242_s16, 0 }
 0x117   :  { %246 = shalt.err (%p328_p1)  }
 0x118   :  { %248 = vsyncmov [#allocation2 + $0x4] }
 0x11b   :  { %s249_s2 = vpop.sfrf %248 }
 0x11c   :  { %p329_p3 = scmp.ne.s32.totalorder %s249_s2, 0 }
 0x11e   :  { %253 = shalt.err (%p329_p3)  }
 0x11f   :  { %255 = vsyncmov [#allocation2 + $0x5] }
 0x122   :  { %s256_s21 = vpop.sfrf %255 }
 0x123   :  { %p330_p2 = scmp.ne.s32.totalorder %s256_s21, 0 }
 0x125   :  { %260 = shalt.err (%p330_p2)  }
 0x126   :  { %262 = vsyncmov [#allocation2 + $0x6] }
 0x129   :  { %s263_s19 = vpop.sfrf %262 }
 0x12a   :  { %p331_p4 = scmp.ne.s32.totalorder %s263_s19, 0 }
 0x12c   :  { %267 = shalt.err (%p331_p4)  }
 0x12d   :  { %269 = vsyncmov [#allocation2 + $0x7] }
 0x130   :  { %s270_s20 = vpop.sfrf %269 }
 0x131   :  { %p332_p5 = scmp.ne.s32.totalorder %s270_s20, 0 }
 0x133   :  { %274 = shalt.err (%p332_p5)  }

</bundles_post_ra>
